<compile_context>
chip_gen: v5e
topology: v5e:2x2
jax: 0.10.0
libtpu: 0.0.40
codegen_flags: <defaults>
</compile_context>

<pallas_src>
import functools

import jax
import jax.numpy as jnp
from jax import lax
from jax.experimental import pallas as pl
from jax.experimental.pallas import tpu as pltpu

_EPS = 1e-6
_LANES = 128
_SUBLANES = 8
_DEFAULT_TILE_ROWS = 2048   # (2048, 128) f32 block = 1 MiB / input / step
_NUM_SPLITS = 2             # leading "parallel" grid axis (dual-TC on v7x)


def _rmse_partial_kernel(x_ref, y_ref, partial_ref, acc_ref, *,
                         tile_rows, blocks_per_split, rows_valid, needs_mask):
    """Accumulates sum((x-y)^2) for one split into an (8, 128) vreg accumulator."""
    k = pl.program_id(1)

    @pl.when(k == 0)
    def _():
        acc_ref[...] = jnp.zeros_like(acc_ref)

    d = x_ref[...].astype(jnp.float32) - y_ref[...].astype(jnp.float32)
    d2 = d * d

    if needs_mask:
        # Nominal (un-clamped) first row of this block; rows at/after
        # `rows_valid` are either block padding or a clamped re-read of the
        # last block -> zero their contribution.
        s = pl.program_id(0)
        base_row = (s * blocks_per_split + k) * tile_rows
        row_ids = base_row + lax.broadcasted_iota(jnp.int32, (tile_rows, 1), 0)
        d2 = jnp.where(row_ids < rows_valid, d2, 0.0)

    # Fold rows into the (8, 128) accumulator: pure VPU adds in the hot loop;
    # the single cross-lane reduction happens later on the tiny partials.
    acc_ref[...] += jnp.sum(
        d2.reshape(tile_rows // _SUBLANES, _SUBLANES, _LANES), axis=0)

    @pl.when(k == pl.num_programs(1) - 1)
    def _():
        partial_ref[...] = acc_ref[...].reshape(1, _SUBLANES, _LANES)


def rmse_loss(x, y, *, tile_rows=_DEFAULT_TILE_ROWS, num_splits=_NUM_SPLITS):
    """RMSE loss: sqrt(mean((x - y)**2) + 1e-6), returned as an f32 scalar."""
    assert x.shape == y.shape, "x and y must have the same shape"
    total_n = int(x.size)
    if total_n == 0:
        return jnp.sqrt(jnp.float32(_EPS))

    xf = jnp.ravel(x)
    yf = jnp.ravel(y)

    # Pad (only when needed) so the flat buffer reshapes to (rows, 128) with
    # rows a multiple of 8. Zero padding contributes 0 to the squared-diff sum.
    chunk = _SUBLANES * _LANES
    padded = pl.cdiv(total_n, chunk) * chunk
    if padded != total_n:
        xf = jnp.pad(xf, (0, padded - total_n))
        yf = jnp.pad(yf, (0, padded - total_n))

    rows = padded // _LANES                       # multiple of 8
    tile_rows = max(_SUBLANES, min(int(tile_rows), rows))
    tile_rows -= tile_rows % _SUBLANES            # keep a multiple of 8
    x2d = xf.reshape(rows, _LANES)
    y2d = yf.reshape(rows, _LANES)

    nb = pl.cdiv(rows, tile_rows)                 # total row-tiles
    num_splits = max(1, min(int(num_splits), nb))
    bps = pl.cdiv(nb, num_splits)                 # row-tiles per split
    needs_mask = (rows % tile_rows != 0) or (bps * num_splits != nb)

    def in_map(s, k):
        # Clamp so the DMA never walks past the array; over-read (duplicate)
        # blocks are zeroed by the in-kernel row mask.
        return (jnp.minimum(s * bps + k, nb - 1), 0)

    kernel = functools.partial(
        _rmse_partial_kernel,
        tile_rows=tile_rows,
        blocks_per_split=bps,
        rows_valid=rows,
        needs_mask=needs_mask,
    )

    in_spec = pl.BlockSpec((tile_rows, _LANES), in_map)
    input_bytes = total_n * (jnp.dtype(x.dtype).itemsize
                             + jnp.dtype(y.dtype).itemsize)

    partials = pl.pallas_call(
        kernel,
        out_shape=jax.ShapeDtypeStruct((num_splits, _SUBLANES, _LANES),
                                       jnp.float32),
        grid_spec=pltpu.PrefetchScalarGridSpec(
            num_scalar_prefetch=0,
            grid=(num_splits, bps),
            in_specs=[in_spec, in_spec],
            out_specs=pl.BlockSpec((1, _SUBLANES, _LANES),
                                   lambda s, k: (s, 0, 0)),
            scratch_shapes=[pltpu.VMEM((_SUBLANES, _LANES), jnp.float32)],
        ),
        compiler_params=pltpu.CompilerParams(
            dimension_semantics=("parallel", "arbitrary"),
        ),
        cost_estimate=pl.CostEstimate(
            flops=3 * total_n,
            transcendentals=0,
            bytes_accessed=input_bytes + num_splits * _SUBLANES * _LANES * 4,
        ),
    )(x2d, y2d)

    # Tiny finalize in plain JAX: one cross-lane reduce, divide, sqrt.
    mse = jnp.sum(partials) / jnp.float32(total_n)
    return jnp.sqrt(mse + jnp.float32(_EPS))


if __name__ == "__main__":
    key = jax.random.PRNGKey(0)
    kx, ky = jax.random.split(key)
    x = jax.random.normal(kx, (2, 4, 16, 16), dtype=jnp.float32)
    y = jax.random.normal(ky, (2, 4, 16, 16), dtype=jnp.float32)

    loss = jax.block_until_ready(rmse_loss(x, y))
    ref = jnp.sqrt(jnp.mean((x - y) ** 2) + _EPS)
    assert jnp.allclose(loss, ref, rtol=1e-5, atol=1e-6), (loss, ref)

    # Extra check: multi-tile, non-even split path (exercises mask + clamp +
    # the leading "parallel" axis) with a small forced tile size.
    k2x, k2y = jax.random.split(jax.random.PRNGKey(1))
    x2 = jax.random.normal(k2x, (3, 8, 128), dtype=jnp.float32)
    y2 = jax.random.normal(k2y, (3, 8, 128), dtype=jnp.float32)
    loss2 = jax.block_until_ready(rmse_loss(x2, y2, tile_rows=8, num_splits=2))
    ref2 = jnp.sqrt(jnp.mean((x2 - y2) ** 2) + _EPS)
    assert jnp.allclose(loss2, ref2, rtol=1e-5, atol=1e-6), (loss2, ref2)

    print("KERNEL_OK")
</pallas_src>

<mosaic_0001>
module attributes {stable_mosaic.version = 11 : i64} {
  func.func @_rmse_partial_kernel(%arg0: i32, %arg1: i32, %arg2: memref<16x128xf32, #tpu.memory_space<vmem>>, %arg3: memref<16x128xf32, #tpu.memory_space<vmem>>, %arg4: memref<1x8x128xf32, #tpu.memory_space<vmem>>, %arg5: memref<8x128xf32, #tpu.memory_space<vmem>>) attributes {dimension_semantics = [#tpu.dimension_semantics<parallel>, #tpu.dimension_semantics<arbitrary>], iteration_bounds = array<i64: 1, 1>, scalar_prefetch = 0 : i64, scratch_operands = 1 : i64, tpu.core_type = #tpu.core_type<tc>, window_params = [{transform_indices = @transform_0, window_bounds = array<i64: 16, 128>}, {transform_indices = @transform_1, window_bounds = array<i64: 16, 128>}, {transform_indices = @transform_2, window_bounds = array<i64: 1, 8, 128>}]} {
    %c0_i32 = arith.constant 0 : i32
    %0 = arith.cmpi eq, %arg1, %c0_i32 : i32
    %1 = arith.extui %0 : i1 to i32
    %c0_i32_0 = arith.constant 0 : i32
    %2 = arith.cmpi ne, %1, %c0_i32_0 : i32
    scf.if %2 {
      %cst_10 = arith.constant 0.000000e+00 : f32
      %15 = vector.broadcast %cst_10 : f32 to vector<8x128xf32>
      %c0_11 = arith.constant 0 : index
      %c0_12 = arith.constant 0 : index
      %16 = vector.load %arg5[%c0_11, %c0_12] : memref<8x128xf32, #tpu.memory_space<vmem>>, vector<8x128xf32>
      tpu.vector_store %arg5[%c0_11, %c0_12], %15 {strides = array<i32>} : memref<8x128xf32, #tpu.memory_space<vmem>>, vector<8x128xf32>,
    } else {
    }
    %c0 = arith.constant 0 : index
    %c0_1 = arith.constant 0 : index
    %3 = vector.load %arg2[%c0, %c0_1] : memref<16x128xf32, #tpu.memory_space<vmem>>, vector<16x128xf32>
    %c0_2 = arith.constant 0 : index
    %c0_3 = arith.constant 0 : index
    %4 = vector.load %arg3[%c0_2, %c0_3] : memref<16x128xf32, #tpu.memory_space<vmem>>, vector<16x128xf32>
    %5 = arith.subf %3, %4 : vector<16x128xf32>
    %6 = arith.mulf %5, %5 : vector<16x128xf32>
    %c0_4 = arith.constant 0 : index
    %c0_5 = arith.constant 0 : index
    %7 = vector.load %arg5[%c0_4, %c0_5] : memref<8x128xf32, #tpu.memory_space<vmem>>, vector<8x128xf32>
    %8 = vector.shape_cast %6 : vector<16x128xf32> to vector<2x8x128xf32>
    %cst = arith.constant dense<0.000000e+00> : vector<8x128xf32>
    %9 = vector.multi_reduction <add>, %8, %cst [0] : vector<2x8x128xf32> to vector<8x128xf32>
    %10 = arith.addf %7, %9 : vector<8x128xf32>
    %c0_6 = arith.constant 0 : index
    %c0_7 = arith.constant 0 : index
    %11 = vector.load %arg5[%c0_6, %c0_7] : memref<8x128xf32, #tpu.memory_space<vmem>>, vector<8x128xf32>
    tpu.vector_store %arg5[%c0_6, %c0_7], %10 {strides = array<i32>} : memref<8x128xf32, #tpu.memory_space<vmem>>, vector<8x128xf32>,
    %c0_i32_8 = arith.constant 0 : i32
    %12 = arith.cmpi eq, %arg1, %c0_i32_8 : i32
    %13 = arith.extui %12 : i1 to i32
    %c0_i32_9 = arith.constant 0 : i32
    %14 = arith.cmpi ne, %13, %c0_i32_9 : i32
    scf.if %14 {
      %c0_10 = arith.constant 0 : index
      %c0_11 = arith.constant 0 : index
      %15 = vector.load %arg5[%c0_10, %c0_11] : memref<8x128xf32, #tpu.memory_space<vmem>>, vector<8x128xf32>
      %16 = vector.shape_cast %15 : vector<8x128xf32> to vector<1x8x128xf32>
      %c0_12 = arith.constant 0 : index
      %c0_13 = arith.constant 0 : index
      %c0_14 = arith.constant 0 : index
      %17 = vector.load %arg4[%c0_12, %c0_13, %c0_14] : memref<1x8x128xf32, #tpu.memory_space<vmem>>, vector<1x8x128xf32>
      tpu.vector_store %arg4[%c0_12, %c0_13, %c0_14], %16 {strides = array<i32>} : memref<1x8x128xf32, #tpu.memory_space<vmem>>, vector<1x8x128xf32>,
    } else {
    }
    return
  }
  func.func @transform_0(%arg0: i32, %arg1: i32) -> (i32, i32) {
    %c1_i32 = arith.constant 1 : i32
    %0 = arith.muli %arg0, %c1_i32 : i32
    %1 = arith.addi %0, %arg1 : i32
    %c0_i32 = arith.constant 0 : i32
    %2 = arith.minsi %1, %c0_i32 : i32
    %c0_i32_0 = arith.constant 0 : i32
    %c0_i32_1 = arith.constant 0 : i32
    return %2, %c0_i32_0 : i32, i32
  }
  func.func @transform_1(%arg0: i32, %arg1: i32) -> (i32, i32) {
    %c1_i32 = arith.constant 1 : i32
    %0 = arith.muli %arg0, %c1_i32 : i32
    %1 = arith.addi %0, %arg1 : i32
    %c0_i32 = arith.constant 0 : i32
    %2 = arith.minsi %1, %c0_i32 : i32
    %c0_i32_0 = arith.constant 0 : i32
    %c0_i32_1 = arith.constant 0 : i32
    return %2, %c0_i32_0 : i32, i32
  }
  func.func @transform_2(%arg0: i32, %arg1: i32) -> (i32, i32, i32) {
    %c0_i32 = arith.constant 0 : i32
    %c0_i32_0 = arith.constant 0 : i32
    %c0_i32_1 = arith.constant 0 : i32
    return %arg0, %c0_i32, %c0_i32_0 : i32, i32, i32
  }
}

</mosaic_0001>

<bundles_post_ra>
// kernel: tpu_custom_call.1
= control target key start
LH: loop header
LB: loop body
LE: loop exit
PB: predicated region body
PF: predicated region fallthrough
CT: control target
= control target key end

     0   :  { %7 = vsyncpa [#allocation4], 0  ;;  %s220_s0 = inlined_call_operand.hbm [shape: f32[16,128], index: 0, kind: input, shape index: {}]   ;;  %s221_s1 = inlined_call_operand.hbm [shape: f32[16,128], index: 1, kind: input, shape index: {}]   ;;  %s222_s2 = inlined_call_operand.hbm [shape: f32[1,8,128], index: 2, kind: output, shape index: {}]  }
   0x1   :  { %8 = vsyncpa [#allocation7], 0 }
   0x2   :  { %9 = vsyncpa [#allocation5], 0  ;;  %s20_s11 = sshll.u32 %s220_s0, 4  ;;  %s191_s12 = smov [#allocation3]   ;;  %s21_s11 = int_to_ptr.hbm [resolvable:$true] %s20_s11 }
   0x3   :  { %s22_s13 = sshll.u32 %s191_s12, 4  ;;  %s39_s16 = sshll.u32 %s221_s1, 4  ;;  %s23_s13 = int_to_ptr.vmem [resolvable:$true] %s22_s13  ;;  %s40_s16 = int_to_ptr.hbm [resolvable:$true] %s39_s16 }
   0x4   :  { %s192_s17 = smov 128   ;;  %s193_s18 = smov 8  }
   0x5   :  { %28 = dma.hbm_to_vmem [thread:$0]  %s21_s11, 256, %s23_s13, [#allocation4], %s192_s17, %s192_s17, %s193_s18  }
   0x6   :  { %s194_s19 = smov [#allocation6]  }
   0x7   :  { %s41_s20 = sshll.u32 %s194_s19, 4  ;;  %s42_s20 = int_to_ptr.vmem [resolvable:$true] %s41_s20 }
   0x8   :  { %47 = dma.hbm_to_vmem [thread:$0]  %s40_s16, 256, %s42_s20, [#allocation7], %s192_s17, %s192_s17, %s193_s18  }
   0x9   :  { %185 = dma.done.wait [#allocation4], 256  }
   0xa   :  { %186 = vsyncadd [#allocation4], 4294967040 }
   0xb   :  { %187 = dma.done.wait [#allocation7], 256  }
   0xc   :  { %188 = vsyncadd [#allocation7], 4294967040  ;;  %v69_v0 = vld [vmem:[#allocation3] sm:$0xff]  ;;  %v70_v1 = vld [vmem:[#allocation3 + $0x8] sm:$0xff]  ;;  %s195_s0 = smov [#allocation8]   ;;  %s93_s23 = sshll.u32 %s222_s2, 4  ;;  %s94_s23 = int_to_ptr.hbm [resolvable:$true] %s93_s23 }
   0xd   :  { %v71_v2 = vld [vmem:[#allocation6] sm:$0xff]  ;;  %v72_v3 = vld [vmem:[#allocation6 + $0x8] sm:$0xff]  ;;  %s91_s1 = sshll.u32 %s195_s0, 4  ;;  %s92_s1 = int_to_ptr.vmem [resolvable:$true] %s91_s1 }
   0xe   :  { %v73_v4 = vsub.f32 %v69_v0, %v71_v2  ;;  %v74_v5 = vsub.f32 %v70_v1, %v72_v3 }
  0x10   :  { %v75_v6 = vmul.f32 %v73_v4, %v73_v4  ;;  %v76_v7 = vmul.f32 %v74_v5, %v74_v5 }
  0x12   :  { %v78_v8 = vadd.f32 %v76_v7, %v75_v6 }
  0x14   :  { %85 = vst [vmem:[#allocation8] sm:$0xff] %v78_v8 }
  0x15   :  { %96 = dma.vmem_to_hbm [thread:$0]  %s92_s1, 128, %s94_s23, [#allocation5]  }
  0x16   :  { %189 = dma.done.wait [#allocation5], 128  }
  0x17   :  { %190 = vsyncadd [#allocation5], 4294967168 }
  0x18   :  { %101 = vsyncpa [#allocation4], 1 }
  0x19   :  { %102 = vsyncpa [#allocation7], 1 }
  0x1a   :  { %103 = vsyncpa [#allocation5], 1 }

</bundles_post_ra>
